<compile_context>
chip_gen: v6e
topology: v6e:2x2x1
jax: 0.10.0
libtpu: 0.0.40
codegen_flags: <defaults>
</compile_context>

<pallas_src>
import functools

import numpy as np
import jax
import jax.numpy as jnp
from jax.experimental import pallas as pl
from jax.experimental.pallas import tpu as pltpu

_VMEM = pl.BlockSpec(memory_space=pltpu.MemorySpace.VMEM)
_EPS = 1e-5
_HI = jax.lax.Precision.HIGHEST


# --------------------------------------------------------------------------- #
# Pallas kernels
# --------------------------------------------------------------------------- #
def _gn_fold_kernel(x_ref, gmap_ref, gmapt_ref, gamma_ref, beta_ref,
                    scale_ref, shift_ref, *, eps, inv_count):
    """Per-batch GroupNorm stats folded into per-channel scale/shift.

    x_ref: (H*W, C); gmap: (C, G) one-hot channel->group map; outputs (1, C).
    The normalize+affine+SiLU itself is applied later in the conv prologue, so
    the normalized activation never round-trips through HBM.
    """
    x = x_ref[...]
    s = jnp.sum(x, axis=0, keepdims=True)                   # (1, C)
    sq = jnp.sum(x * x, axis=0, keepdims=True)               # (1, C)
    mean_g = jnp.dot(s, gmap_ref[...],
                     preferred_element_type=jnp.float32) * inv_count   # (1, G)
    ex2_g = jnp.dot(sq, gmap_ref[...],
                    preferred_element_type=jnp.float32) * inv_count
    var_g = ex2_g - mean_g * mean_g
    rstd_g = jax.lax.rsqrt(var_g + eps)
    mean_c = jnp.dot(mean_g, gmapt_ref[...], preferred_element_type=jnp.float32)
    rstd_c = jnp.dot(rstd_g, gmapt_ref[...], preferred_element_type=jnp.float32)
    scale = gamma_ref[...] * rstd_c
    scale_ref[...] = scale
    shift_ref[...] = beta_ref[...] - mean_c * scale


def _silu_matmul_bias_kernel(x_ref, w_ref, b_ref, o_ref):
    """o = silu(x) @ w + b  (time-embedding projection with fused SiLU)."""
    x = x_ref[...]
    xs = x * jax.nn.sigmoid(x)
    o_ref[...] = (jnp.dot(xs, w_ref[...], preferred_element_type=jnp.float32)
                  + b_ref[...])


def _conv_row(x_ref, w_ref, cs_ref, scale, shift, r, h_in, h_out):
    """One output row of a 3x3 'same' conv, with an optional fused GN+SiLU
    prologue and fused nearest resize (h_out/w_out may exceed the input size).

    x_ref: (h_in, w_in, Cin) per-batch raw input (VMEM resident)
    w_ref: (3, 3, Cin, Cout)
    cs_ref: (3, w_out, w_in) 0/1 column shift / upsample-selection matrices
    returns (w_out, Cout) float32.
    """
    acc = None
    for dy in range(3):
        p = r + dy                                           # padded output-space row
        valid = jnp.logical_and(p >= 1, p <= h_out).astype(jnp.float32)
        src = jnp.clip(((p - 1) * h_in) // h_out, 0, h_in - 1)
        xrow = x_ref[src]                                    # (w_in, Cin)
        if scale is not None:                                # fused GroupNorm + SiLU
            y = xrow * scale + shift
            xrow = y * jax.nn.sigmoid(y)
        xrow = xrow * valid                                  # zero-pad boundary rows
        for dx in range(3):
            m = jnp.dot(xrow, w_ref[dy, dx], preferred_element_type=jnp.float32)
            tap = jnp.dot(cs_ref[dx], m, preferred_element_type=jnp.float32)
            acc = tap if acc is None else acc + tap
    return acc


def _make_conv_kernel(has_gn, has_add_row, has_shortcut, h_in, h_out):
    def kernel(*refs):
        it = iter(refs)
        x_ref = next(it)
        scale_ref = next(it) if has_gn else None
        shift_ref = next(it) if has_gn else None
        w_ref = next(it)
        b_ref = next(it)
        t_ref = next(it) if has_add_row else None
        if has_shortcut:
            xs_ref = next(it)
            sw_ref = next(it)
            sb_ref = next(it)
        cs_ref = next(it)
        o_ref = next(it)

        r = pl.program_id(1)
        scale = scale_ref[...] if has_gn else None
        shift = shift_ref[...] if has_gn else None
        acc = _conv_row(x_ref, w_ref, cs_ref, scale, shift, r, h_in, h_out)
        acc = acc + b_ref[...]
        if has_add_row:                       # + time-embedding row (per batch)
            acc = acc + t_ref[...]
        if has_shortcut:                      # + 1x1-shortcut / residual
            acc = acc + (jnp.dot(xs_ref[r], sw_ref[...],
                                 preferred_element_type=jnp.float32)
                         + sb_ref[...])
        o_ref[0] = acc
    return kernel


# --------------------------------------------------------------------------- #
# Kernel-backed ops (glue: host constants, reshapes only)
# --------------------------------------------------------------------------- #
def _col_select_mats(w_in, w_out):
    """(3, w_out, w_in) 0/1 matrices: tap dx, output col c -> source input col
    via nearest mapping, with the conv's zero-padding columns zeroed out."""
    mats = np.zeros((3, w_out, w_in), np.float32)
    for dx in range(3):
        for c in range(w_out):
            q = c + dx                                        # padded output col
            if 1 <= q <= w_out:
                mats[dx, c, ((q - 1) * w_in) // w_out] = 1.0
    return jnp.asarray(mats)


def gn_fold_params(x_nhwc, gamma, beta, groups, eps=_EPS):
    N, H, W, C = x_nhwc.shape
    assert C % groups == 0
    cg = C // groups
    gmap = jnp.asarray(np.repeat(np.eye(groups, dtype=np.float32), cg, axis=0))
    x3 = x_nhwc.reshape(N, H * W, C)
    kern = functools.partial(_gn_fold_kernel, eps=eps, inv_count=1.0 / (H * W * cg))
    return pl.pallas_call(
        kern,
        out_shape=(jax.ShapeDtypeStruct((N, 1, C), jnp.float32),
                   jax.ShapeDtypeStruct((N, 1, C), jnp.float32)),
        grid=(N,),
        in_specs=[
            pl.BlockSpec((None, H * W, C), lambda n: (n, 0, 0)),
            pl.BlockSpec((C, groups), lambda n: (0, 0)),
            pl.BlockSpec((groups, C), lambda n: (0, 0)),
            pl.BlockSpec((1, C), lambda n: (0, 0)),
            pl.BlockSpec((1, C), lambda n: (0, 0)),
        ],
        out_specs=(pl.BlockSpec((None, 1, C), lambda n: (n, 0, 0)),
                   pl.BlockSpec((None, 1, C), lambda n: (n, 0, 0))),
        compiler_params=pltpu.CompilerParams(dimension_semantics=("parallel",)),
    )(x3, gmap, jnp.transpose(gmap), gamma.reshape(1, C), beta.reshape(1, C))


def temb_proj(emb, w, b):
    n = emb.shape[0]
    cout = w.shape[-1]
    return pl.pallas_call(
        _silu_matmul_bias_kernel,
        out_shape=jax.ShapeDtypeStruct((n, cout), jnp.float32),
        in_specs=[_VMEM, _VMEM, _VMEM],
        out_specs=_VMEM,
    )(emb, w, b.reshape(1, cout))


def conv3x3_fused(x, w, b, *, gn_scale=None, gn_shift=None, add_row=None,
                  shortcut_x=None, shortcut_w=None, shortcut_b=None, out_hw=None):
    """Fused: [GN+SiLU] -> (nearest resize ->) 3x3 'same' conv -> +bias
    [-> +add_row[n]] [-> + shortcut_x @ shortcut_w + shortcut_b]."""
    N, H, W, Cin = x.shape
    Cout = w.shape[-1]
    H_out, W_out = (H, W) if out_hw is None else (int(out_hw[0]), int(out_hw[1]))
    cs = _col_select_mats(W, W_out)
    has_gn = gn_scale is not None
    has_add = add_row is not None
    has_sc = shortcut_x is not None
    kernel = _make_conv_kernel(has_gn, has_add, has_sc, H, H_out)

    inputs = [x]
    specs = [pl.BlockSpec((None, H, W, Cin), lambda n, r: (n, 0, 0, 0))]
    if has_gn:
        inputs += [gn_scale, gn_shift]
        specs += [pl.BlockSpec((None, 1, Cin), lambda n, r: (n, 0, 0)),
                  pl.BlockSpec((None, 1, Cin), lambda n, r: (n, 0, 0))]
    inputs += [w, b.reshape(1, Cout)]
    specs += [pl.BlockSpec((3, 3, Cin, Cout), lambda n, r: (0, 0, 0, 0)),
              pl.BlockSpec((1, Cout), lambda n, r: (0, 0))]
    if has_add:
        inputs.append(add_row)
        specs.append(pl.BlockSpec((None, 1, Cout), lambda n, r: (n, 0, 0)))
    if has_sc:
        csh = shortcut_x.shape[-1]
        inputs += [shortcut_x, shortcut_w, shortcut_b.reshape(1, Cout)]
        specs += [pl.BlockSpec((None, H, W, csh), lambda n, r: (n, 0, 0, 0)),
                  pl.BlockSpec((csh, Cout), lambda n, r: (0, 0)),
                  pl.BlockSpec((1, Cout), lambda n, r: (0, 0))]
    inputs.append(cs)
    specs.append(pl.BlockSpec((3, W_out, W), lambda n, r: (0, 0, 0)))

    return pl.pallas_call(
        kernel,
        out_shape=jax.ShapeDtypeStruct((N, H_out, W_out, Cout), jnp.float32),
        grid=(N, H_out),
        in_specs=specs,
        out_specs=pl.BlockSpec((None, 1, W_out, Cout), lambda n, r: (n, r, 0, 0)),
        compiler_params=pltpu.CompilerParams(
            dimension_semantics=("parallel", "parallel")),
    )(*inputs)


def resnet_block(x_nhwc, temb, p):
    """diffusers ResnetBlock2D (eval mode, output_scale_factor=1)."""
    N, H, W, Cin = x_nhwc.shape
    Cout = p["conv1_w"].shape[-1]
    groups = p["groups"]

    sc1, sh1 = gn_fold_params(x_nhwc, p["gn1_g"], p["gn1_b"], groups)
    t = temb_proj(temb, p["temb_w"], p["temb_b"]).reshape(N, 1, Cout)
    h = conv3x3_fused(x_nhwc, p["conv1_w"], p["conv1_b"],
                      gn_scale=sc1, gn_shift=sh1, add_row=t)

    sc2, sh2 = gn_fold_params(h, p["gn2_g"], p["gn2_b"], groups)
    if "short_w" in p:
        sw, sb = p["short_w"], p["short_b"]
    else:                                    # identity shortcut (in_ch == out_ch)
        sw = jnp.eye(Cin, dtype=jnp.float32)
        sb = jnp.zeros((Cout,), jnp.float32)
    out = conv3x3_fused(h, p["conv2_w"], p["conv2_b"],
                        gn_scale=sc2, gn_shift=sh2,
                        shortcut_x=x_nhwc, shortcut_w=sw, shortcut_b=sb)
    return out


def upsample2d(x_nhwc, w, b, out_hw=None):
    """Upsample2D: nearest resize (default 2x) fused into the trailing conv."""
    N, H, W, C = x_nhwc.shape
    if out_hw is None:
        out_hw = (2 * H, 2 * W)
    return conv3x3_fused(x_nhwc, w, b, out_hw=out_hw)


# --------------------------------------------------------------------------- #
# UnetUpBlockLayer forward (shared skeleton; Pallas or pure-JAX inner ops)
# --------------------------------------------------------------------------- #
def up_block_forward(params, inputs, is_final_block, resnet_fn, upsample_fn):
    (sample, timesteps, emb, encoder_hidden_states,
     *down_block_res_samples, forward_upsample_size) = inputs
    n_res = len(params["resnets"])
    res_samples = down_block_res_samples[-n_res:]
    down_block_res_samples = down_block_res_samples[:-n_res]
    if (not is_final_block) and forward_upsample_size:
        upsample_size = down_block_res_samples[-1].shape[2:]   # NCHW spatial dims
    else:
        upsample_size = None

    hidden = jnp.transpose(sample, (0, 2, 3, 1))               # NCHW -> NHWC
    for rp, res in zip(params["resnets"], reversed(res_samples)):
        res_nhwc = jnp.transpose(res, (0, 2, 3, 1))
        hidden = jnp.concatenate([hidden, res_nhwc], axis=-1)  # cat on channels
        hidden = resnet_fn(hidden, emb, rp)
    if params.get("upsampler") is not None:
        up = params["upsampler"]
        hidden = upsample_fn(hidden, up["w"], up["b"], upsample_size)
    sample_out = jnp.transpose(hidden, (0, 3, 1, 2))           # NHWC -> NCHW
    return (sample_out, timesteps, emb, encoder_hidden_states,
            *down_block_res_samples, forward_upsample_size)


# --------------------------------------------------------------------------- #
# Pure-JAX reference (for numerical verification)
# --------------------------------------------------------------------------- #
def ref_groupnorm_silu(x, gamma, beta, groups, eps=_EPS):
    N, H, W, C = x.shape
    xg = x.reshape(N, H, W, groups, C // groups)
    mean = xg.mean(axis=(1, 2, 4), keepdims=True)
    var = xg.var(axis=(1, 2, 4), keepdims=True)
    xn = ((xg - mean) / jnp.sqrt(var + eps)).reshape(N, H, W, C)
    return jax.nn.silu(xn * gamma + beta)


def ref_conv3x3(x, w, b):
    y = jax.lax.conv_general_dilated(
        x, w, (1, 1), ((1, 1), (1, 1)),
        dimension_numbers=("NHWC", "HWIO", "NHWC"), precision=_HI)
    return y + b


def ref_resnet(x, temb, p):
    h = ref_groupnorm_silu(x, p["gn1_g"], p["gn1_b"], p["groups"])
    h = ref_conv3x3(h, p["conv1_w"], p["conv1_b"])
    t = jnp.dot(jax.nn.silu(temb), p["temb_w"], precision=_HI) + p["temb_b"]
    h = h + t[:, None, None, :]
    h = ref_groupnorm_silu(h, p["gn2_g"], p["gn2_b"], p["groups"])
    h = ref_conv3x3(h, p["conv2_w"], p["conv2_b"])
    sc = x
    if "short_w" in p:
        sc = jnp.einsum("nhwc,cd->nhwd", x, p["short_w"], precision=_HI) + p["short_b"]
    return sc + h


def ref_upsample(x, w, b, out_hw=None):
    N, H, W, C = x.shape
    if out_hw is None:
        out_hw = (2 * H, 2 * W)
    x = jnp.repeat(jnp.repeat(x, out_hw[0] // H, axis=1), out_hw[1] // W, axis=2)
    return ref_conv3x3(x, w, b)


# --------------------------------------------------------------------------- #
# Deterministic parameter init
# --------------------------------------------------------------------------- #
def init_resnet_params(key, in_ch, out_ch, temb_dim, groups):
    ks = jax.random.split(key, 12)
    p = {
        "groups": groups,
        "gn1_g": 1.0 + 0.1 * jax.random.normal(ks[0], (in_ch,), jnp.float32),
        "gn1_b": 0.1 * jax.random.normal(ks[1], (in_ch,), jnp.float32),
        "conv1_w": 0.1 * jax.random.normal(ks[2], (3, 3, in_ch, out_ch), jnp.float32),
        "conv1_b": 0.05 * jax.random.normal(ks[3], (out_ch,), jnp.float32),
        "temb_w": 0.1 * jax.random.normal(ks[4], (temb_dim, out_ch), jnp.float32),
        "temb_b": 0.05 * jax.random.normal(ks[5], (out_ch,), jnp.float32),
        "gn2_g": 1.0 + 0.1 * jax.random.normal(ks[6], (out_ch,), jnp.float32),
        "gn2_b": 0.1 * jax.random.normal(ks[7], (out_ch,), jnp.float32),
        "conv2_w": 0.1 * jax.random.normal(ks[8], (3, 3, out_ch, out_ch), jnp.float32),
        "conv2_b": 0.05 * jax.random.normal(ks[9], (out_ch,), jnp.float32),
    }
    if in_ch != out_ch:
        p["short_w"] = 0.1 * jax.random.normal(ks[10], (in_ch, out_ch), jnp.float32)
        p["short_b"] = 0.05 * jax.random.normal(ks[11], (out_ch,), jnp.float32)
    return p


if __name__ == "__main__":
    key = jax.random.PRNGKey(0)
    N, H, W = 2, 8, 8
    C_prev, C_res, C_out = 4, 4, 4
    temb_dim, seq, cross_dim = 32, 8, 32
    groups = 2
    is_final_block = False

    k_par, k_in = jax.random.split(key)
    kr0, kr1, ku = jax.random.split(k_par, 3)
    params = {
        "resnets": [
            init_resnet_params(kr0, C_prev + C_res, C_out, temb_dim, groups),
            init_resnet_params(kr1, C_out + C_res, C_out, temb_dim, groups),
        ],
        "upsampler": {
            "w": 0.1 * jax.random.normal(ku, (3, 3, C_out, C_out), jnp.float32),
            "b": jnp.zeros((C_out,), jnp.float32),
        },
    }

    ki = jax.random.split(k_in, 6)
    sample = jax.random.normal(ki[0], (N, C_prev, H, W), jnp.float32)      # NCHW
    timesteps = jnp.array([10, 20], dtype=jnp.int32)
    emb = jax.random.normal(ki[1], (N, temb_dim), jnp.float32)
    encoder_hidden_states = jax.random.normal(ki[2], (N, seq, cross_dim), jnp.float32)
    res0 = jax.random.normal(ki[3], (N, C_res, H, W), jnp.float32)  # stays in queue
    res1 = jax.random.normal(ki[4], (N, C_res, H, W), jnp.float32)  # consumed 2nd
    res2 = jax.random.normal(ki[5], (N, C_res, H, W), jnp.float32)  # consumed 1st
    forward_upsample_size = False

    inputs = (sample, timesteps, emb, encoder_hidden_states,
              res0, res1, res2, forward_upsample_size)

    outputs = up_block_forward(params, inputs, is_final_block,
                               resnet_fn=resnet_block, upsample_fn=upsample2d)
    jax.block_until_ready(outputs[0])

    ref_outputs = up_block_forward(params, inputs, is_final_block,
                                   resnet_fn=ref_resnet, upsample_fn=ref_upsample)

    assert outputs[0].shape == (N, C_out, 2 * H, 2 * W)
    assert len(outputs) == 6  # sample, timesteps, emb, ehs, res0, flag
    np.testing.assert_allclose(np.asarray(outputs[0]), np.asarray(ref_outputs[0]),
                               rtol=2e-3, atol=2e-3)
    print("KERNEL_OK")
</pallas_src>

<mosaic_0001>
module attributes {stable_mosaic.version = 11 : i64} {
  func.func @_gn_fold_kernel(%arg0: i32, %arg1: memref<1x64x8xf32, #tpu.memory_space<vmem>>, %arg2: memref<8x2xf32, #tpu.memory_space<vmem>>, %arg3: memref<2x8xf32, #tpu.memory_space<vmem>>, %arg4: memref<1x8xf32, #tpu.memory_space<vmem>>, %arg5: memref<1x8xf32, #tpu.memory_space<vmem>>, %arg6: memref<1x1x8xf32, #tpu.memory_space<vmem>>, %arg7: memref<1x1x8xf32, #tpu.memory_space<vmem>>) attributes {dimension_semantics = [#tpu.dimension_semantics<parallel>], iteration_bounds = array<i64: 2>, scalar_prefetch = 0 : i64, scratch_operands = 0 : i64, tpu.core_type = #tpu.core_type<tc>, window_params = [{transform_indices = @transform_0, window_bounds = array<i64: 1, 64, 8>}, {pipeline_mode = #tpu.pipeline_mode<synchronous>, transform_indices = @transform_1, window_bounds = array<i64: 8, 2>}, {pipeline_mode = #tpu.pipeline_mode<synchronous>, transform_indices = @transform_2, window_bounds = array<i64: 2, 8>}, {pipeline_mode = #tpu.pipeline_mode<synchronous>, transform_indices = @transform_3, window_bounds = array<i64: 1, 8>}, {pipeline_mode = #tpu.pipeline_mode<synchronous>, transform_indices = @transform_4, window_bounds = array<i64: 1, 8>}, {transform_indices = @transform_5, window_bounds = array<i64: 1, 1, 8>}, {transform_indices = @transform_6, window_bounds = array<i64: 1, 1, 8>}]} {
    %c0 = arith.constant 0 : index
    %c0_0 = arith.constant 0 : index
    %c0_1 = arith.constant 0 : index
    %0 = vector.load %arg1[%c0, %c0_0, %c0_1] : memref<1x64x8xf32, #tpu.memory_space<vmem>>, vector<1x64x8xf32>
    %1 = vector.shape_cast %0 : vector<1x64x8xf32> to vector<64x8xf32>
    %cst = arith.constant dense<0.000000e+00> : vector<8xf32>
    %2 = vector.multi_reduction <add>, %1, %cst [0] : vector<64x8xf32> to vector<8xf32>
    %3 = vector.shape_cast %2 : vector<8xf32> to vector<1x8xf32>
    %4 = arith.mulf %1, %1 : vector<64x8xf32>
    %cst_2 = arith.constant dense<0.000000e+00> : vector<8xf32>
    %5 = vector.multi_reduction <add>, %4, %cst_2 [0] : vector<64x8xf32> to vector<8xf32>
    %6 = vector.shape_cast %5 : vector<8xf32> to vector<1x8xf32>
    %c0_3 = arith.constant 0 : index
    %c0_4 = arith.constant 0 : index
    %7 = vector.load %arg2[%c0_3, %c0_4] : memref<8x2xf32, #tpu.memory_space<vmem>>, vector<8x2xf32>
    %cst_5 = arith.constant dense<0.000000e+00> : vector<1x2xf32>
    %8 = tpu.matmul %3, %7, %cst_5 {dimension_numbers = #tpu.dot_dimension_numbers<[1], [0], [0], [1], [0, 0, 1, 1], [], []>} : vector<1x8xf32>, vector<8x2xf32>, vector<1x2xf32> -> vector<1x2xf32>
    %cst_6 = arith.constant 3.906250e-03 : f32
    %9 = vector.broadcast %cst_6 : f32 to vector<1x2xf32>
    %10 = arith.mulf %8, %9 : vector<1x2xf32>
    %c0_7 = arith.constant 0 : index
    %c0_8 = arith.constant 0 : index
    %11 = vector.load %arg2[%c0_7, %c0_8] : memref<8x2xf32, #tpu.memory_space<vmem>>, vector<8x2xf32>
    %cst_9 = arith.constant dense<0.000000e+00> : vector<1x2xf32>
    %12 = tpu.matmul %6, %11, %cst_9 {dimension_numbers = #tpu.dot_dimension_numbers<[1], [0], [0], [1], [0, 0, 1, 1], [], []>} : vector<1x8xf32>, vector<8x2xf32>, vector<1x2xf32> -> vector<1x2xf32>
    %cst_10 = arith.constant 3.906250e-03 : f32
    %13 = vector.broadcast %cst_10 : f32 to vector<1x2xf32>
    %14 = arith.mulf %12, %13 : vector<1x2xf32>
    %15 = arith.mulf %10, %10 : vector<1x2xf32>
    %16 = arith.subf %14, %15 : vector<1x2xf32>
    %cst_11 = arith.constant 9.99999974E-6 : f32
    %17 = vector.broadcast %cst_11 : f32 to vector<1x2xf32>
    %18 = arith.addf %16, %17 : vector<1x2xf32>
    %19 = math.rsqrt %18 : vector<1x2xf32>
    %c0_12 = arith.constant 0 : index
    %c0_13 = arith.constant 0 : index
    %20 = vector.load %arg3[%c0_12, %c0_13] : memref<2x8xf32, #tpu.memory_space<vmem>>, vector<2x8xf32>
    %cst_14 = arith.constant dense<0.000000e+00> : vector<1x8xf32>
    %21 = tpu.matmul %10, %20, %cst_14 {dimension_numbers = #tpu.dot_dimension_numbers<[1], [0], [0], [1], [0, 0, 1, 1], [], []>} : vector<1x2xf32>, vector<2x8xf32>, vector<1x8xf32> -> vector<1x8xf32>
    %c0_15 = arith.constant 0 : index
    %c0_16 = arith.constant 0 : index
    %22 = vector.load %arg3[%c0_15, %c0_16] : memref<2x8xf32, #tpu.memory_space<vmem>>, vector<2x8xf32>
    %cst_17 = arith.constant dense<0.000000e+00> : vector<1x8xf32>
    %23 = tpu.matmul %19, %22, %cst_17 {dimension_numbers = #tpu.dot_dimension_numbers<[1], [0], [0], [1], [0, 0, 1, 1], [], []>} : vector<1x2xf32>, vector<2x8xf32>, vector<1x8xf32> -> vector<1x8xf32>
    %c0_18 = arith.constant 0 : index
    %c0_19 = arith.constant 0 : index
    %24 = vector.load %arg4[%c0_18, %c0_19] : memref<1x8xf32, #tpu.memory_space<vmem>>, vector<1x8xf32>
    %25 = arith.mulf %24, %23 : vector<1x8xf32>
    %c0_20 = arith.constant 0 : index
    %c0_21 = arith.constant 0 : index
    %c0_22 = arith.constant 0 : index
    %26 = vector.load %arg6[%c0_20, %c0_21, %c0_22] : memref<1x1x8xf32, #tpu.memory_space<vmem>>, vector<1x1x8xf32>
    %27 = vector.shape_cast %26 : vector<1x1x8xf32> to vector<1x8xf32>
    %28 = vector.shape_cast %25 : vector<1x8xf32> to vector<1x1x8xf32>
    tpu.vector_store %arg6[%c0_20, %c0_21, %c0_22], %28 {strides = array<i32>} : memref<1x1x8xf32, #tpu.memory_space<vmem>>, vector<1x1x8xf32>,
    %c0_23 = arith.constant 0 : index
    %c0_24 = arith.constant 0 : index
    %29 = vector.load %arg5[%c0_23, %c0_24] : memref<1x8xf32, #tpu.memory_space<vmem>>, vector<1x8xf32>
    %30 = arith.mulf %21, %25 : vector<1x8xf32>
    %31 = arith.subf %29, %30 : vector<1x8xf32>
    %c0_25 = arith.constant 0 : index
    %c0_26 = arith.constant 0 : index
    %c0_27 = arith.constant 0 : index
    %32 = vector.load %arg7[%c0_25, %c0_26, %c0_27] : memref<1x1x8xf32, #tpu.memory_space<vmem>>, vector<1x1x8xf32>
    %33 = vector.shape_cast %32 : vector<1x1x8xf32> to vector<1x8xf32>
    %34 = vector.shape_cast %31 : vector<1x8xf32> to vector<1x1x8xf32>
    tpu.vector_store %arg7[%c0_25, %c0_26, %c0_27], %34 {strides = array<i32>} : memref<1x1x8xf32, #tpu.memory_space<vmem>>, vector<1x1x8xf32>,
    return
  }
  func.func @transform_0(%arg0: i32) -> (i32, i32, i32) {
    %c0_i32 = arith.constant 0 : i32
    %c0_i32_0 = arith.constant 0 : i32
    %c0_i32_1 = arith.constant 0 : i32
    return %arg0, %c0_i32, %c0_i32_0 : i32, i32, i32
  }
  func.func @transform_1(%arg0: i32) -> (i32, i32) {
    %c0_i32 = arith.constant 0 : i32
    %c0_i32_0 = arith.constant 0 : i32
    %c0_i32_1 = arith.constant 0 : i32
    return %c0_i32, %c0_i32_0 : i32, i32
  }
  func.func @transform_2(%arg0: i32) -> (i32, i32) {
    %c0_i32 = arith.constant 0 : i32
    %c0_i32_0 = arith.constant 0 : i32
    %c0_i32_1 = arith.constant 0 : i32
    return %c0_i32, %c0_i32_0 : i32, i32
  }
  func.func @transform_3(%arg0: i32) -> (i32, i32) {
    %c0_i32 = arith.constant 0 : i32
    %c0_i32_0 = arith.constant 0 : i32
    %c0_i32_1 = arith.constant 0 : i32
    return %c0_i32, %c0_i32_0 : i32, i32
  }
  func.func @transform_4(%arg0: i32) -> (i32, i32) {
    %c0_i32 = arith.constant 0 : i32
    %c0_i32_0 = arith.constant 0 : i32
    %c0_i32_1 = arith.constant 0 : i32
    return %c0_i32, %c0_i32_0 : i32, i32
  }
  func.func @transform_5(%arg0: i32) -> (i32, i32, i32) {
    %c0_i32 = arith.constant 0 : i32
    %c0_i32_0 = arith.constant 0 : i32
    %c0_i32_1 = arith.constant 0 : i32
    return %arg0, %c0_i32, %c0_i32_0 : i32, i32, i32
  }
  func.func @transform_6(%arg0: i32) -> (i32, i32, i32) {
    %c0_i32 = arith.constant 0 : i32
    %c0_i32_0 = arith.constant 0 : i32
    %c0_i32_1 = arith.constant 0 : i32
    return %arg0, %c0_i32, %c0_i32_0 : i32, i32, i32
  }
}

</mosaic_0001>

<bundles_post_ra>
// kernel: tpu_custom_call.1
= control target key start
LH: loop header
LB: loop body
LE: loop exit
PB: predicated region body
PF: predicated region fallthrough
CT: control target
= control target key end

     0   :  { %12 = vsyncpa [#allocation3], 0  ;;  %s1143_s0 = inlined_call_operand.vmem [shape: f32[2,64,8], index: 0, kind: input, shape index: {}]   ;;  %s1144_s1 = inlined_call_operand.vmem [shape: f32[8,2], index: 1, kind: input, shape index: {}]   ;;  %s1145_s2 = inlined_call_operand.vmem [shape: f32[2,8], index: 2, kind: input, shape index: {}]   ;;  %s1146_s3 = inlined_call_operand.vmem [shape: f32[1,8], index: 3, kind: input, shape index: {}]   ;;  %s1147_s4 = inlined_call_operand.vmem [shape: f32[1,8], index: 4, kind: input, shape index: {}]   ;;  %s1148_s5 = inlined_call_operand.hbm [shape: f32[2,1,8], index: 5, kind: output, shape index: {0}]   ;;  %s1149_s6 = inlined_call_operand.hbm [shape: f32[2,1,8], index: 6, kind: output, shape index: {1}]  }
   0x1   :  { %14 = vsyncpa [#allocation3 + $0x1], 0 }
   0x2   :  { %15 = vsyncpa [#allocation5], 0 }
   0x3   :  { %17 = vsyncpa [#allocation5 + $0x1], 0  ;;  %s968_s21 = smov 0   ;;  %s970_s22 = smov 0  }
   0x4   :  { %s972_s23 = smov 0   ;;  %s974_s24 = smov 0  }
   0x5 LB: > { %s989_s25 = sadd.s32 4294967295, %s927_s24   ;;  %s744_s26 = sadd.s32 4294967294, %s927_s24   ;;  %s927_s24 = sphi %s974_s24, %s1157_s24   ;;  %s923_s23 = sphi %s972_s23, %s1156_s23   ;;  %s919_s22 = sphi %s970_s22, %s1155_s22   ;;  %s915_s21 = sphi %s968_s21, %s1154_s21  }
   0x6   : > { %s993_s27 = sadd.s32 1, %s927_s24   ;;  %s140_s28 = sadd.s32 1, %s923_s23 }
   0x7   : > { %s137_s29 = ssub.s32 %s927_s24, %s993_s27  ;;  %p150_p0 = scmp.ne.s32.totalorder %s923_s23, %s919_s22 }
   0x8   : > { %p138_p1 = scmp.eq.s32.totalorder %s137_s29, 0  ;;  %p151_p2 = scmp.eq.s32.totalorder %s989_s25, 1 }
   0x9   : > { %p156_p3 = scmp.ne.s32.totalorder %s919_s22, %s915_s21  ;;  %p157_p4 = scmp.eq.s32.totalorder %s744_s26, 1 }
   0xa   : > { %s1004_s30 = scalar_select %p138_p1, %s923_s23, %s140_s28  }
   0xb   : > { %p1006_p5 = por %p151_p2, %p150_p0  ;;  %p1010_p6 = por %p157_p4, %p156_p3 }
   0xc   : > { %p747_p7 = scmp.ge.s32.totalorder %s927_s24, 1  ;;  %p221_p8 = scmp.lt.s32.totalorder %s927_s24, 3 }
   0xe   : > { %p222_p9 = pnand %p747_p7, %p221_p8 }
   0xf   : > { %p254_p10 = scmp.lt.s32.totalorder (!%p222_p9), %s989_s25, 1  ;;  %s1058_s18 = sand.u32 (!%p222_p9), 1, %s919_s22  }
  0x10   : > { %225 = sbr.rel (%p222_p9) target bundleno = 500 (0x1f4), region = 40  ;;  %s756_s26 = sshll.u32 (!%p222_p9), %s989_s25, 4 }
  0x11   : > { %s247_s28 = scalar_lea.vmem (!%p222_p9), [#allocation2], %s1058_s18  ;;  %s1150_s14 = scalar_lea.vmem (!%p222_p9), [#allocation4], %s1058_s18 }
  0x12   : > { %s648_s29 = sshll.u32 (!%p222_p9), %s247_s28, 4  ;;  %s632_s16 = scalar_lea.sflag (!%p222_p9), [#allocation3], %s1058_s18  ;;  %s1072_s29 = int_to_ptr.vmem [resolvable:$true] %s648_s29 }
  0x13   : > { %s837_s17 = scalar_lea.vmem (!%p222_p9), %s1072_s29, 16  ;;  %s931_s19 = smov (!%p222_p9), [#allocation2]  }
  0x14   : > { %p838_p11 = scmp.ne.s32.totalorder (!%p222_p9), %s1072_s29, %s837_s17  ;;  %s841_s20 = sshll.u32 (!%p222_p9), %s931_s19, 4  ;;  %s842_s20 = int_to_ptr.vmem [resolvable:$false] %s841_s20 }
  0x15   : > { %v318_v0 = vld [vmem:[%s1144_s1] sm:$0xff]  ;;  %v929_v1 = vmov 0.0   ;;  %vm930_vm0 = vmmov 0   ;;  %s255_s11 = scalar_select %p254_p10, %s989_s25, 1  ;;  %vm267_vm1 = vcmask 64512   ;;  %vm476_vm2 = vcmask 1041408  }
  0x16   : > { %769 = vmatprep.subr.mxu0 %v929_v1  ;;  %771 = vmatprep.mubr.msk.f32.mxu0 %vm930_vm0, %v929_v1  ;;  %v471_v60 = vld [vmem:[%s1145_s2] sm:$0x3]  ;;  %vm472_vm3 = vcmask 15360   ;;  %vm625_vm4 = vcmask 57344   ;;  %p839_p12 = pnand %p838_p11, %p1006_p5  ;;  %s843_s9 = scalar_lea.vmem %s842_s20, 32 }
  0x17   : > { %770 = vmatpush3.msra.mxu0 %v318_v0  ;;  %774 = vmatprep.subr.mxu1 %v929_v1  ;;  %s760_s12 = sshll.u32 %s255_s11, 6  ;;  %s1070_s11 = scalar_lea.hbm %s1148_s5, %s756_s26 }
  0x18   : > { %775 = vmatpush3.msra.mxu1 %v318_v0  ;;  %776 = vmatprep.mubr.msk.f32.mxu1 %vm930_vm0, %v929_v1  ;;  %s258_s15 = scalar_lea.vmem %s1143_s0, %s760_s12  ;;  %p840_p13 = pneg %p839_p12 }
  0x19   : > { %779 = vmatprep.subr.mxu0 %v929_v1  ;;  %784 = vmatprep.subr.mxu1 %v929_v1  ;;  %v259_v2 = vld [vmem:[%s258_s15] sm:$0xff]  ;;  %v260_v3 = vld [vmem:[%s258_s15 + $0x8] sm:$0xff]  ;;  %v261_v4 = vld [vmem:[%s258_s15 + $0x10] sm:$0xff]  ;;  %p844_p0 = scmp.lt.s32.totalorder %s1072_s29, %s842_s20  ;;  %p845_p1 = scmp.lt.s32.totalorder %s843_s9, %s837_s17 }
  0x1a   : > { %v262_v5 = vld [vmem:[%s258_s15 + $0x18] sm:$0xff]  ;;  %v268_v6 = vsel %vm267_vm1, %v259_v2, 0.0  ;;  %v269_v7 = vsel %vm267_vm1, %v260_v3, 0.0  ;;  %v271_v8 = vsel %vm267_vm1, %v261_v4, 0.0  ;;  %v289_v9 = vmul.f32 %v259_v2, %v259_v2  ;;  %v263_v10 = vld [vmem:[%s258_s15 + $0x20] sm:$0xff]  ;;  %v264_v15 = vld [vmem:[%s258_s15 + $0x28] sm:$0xff] }
  0x1b   : > { %v270_v11 = vadd.f32 %v269_v7, %v268_v6  ;;  %v273_v12 = vsel %vm267_vm1, %v262_v5, 0.0  ;;  %v290_v13 = vmul.f32 %v260_v3, %v260_v3  ;;  %v291_v14 = vmul.f32 %v261_v4, %v261_v4  ;;  %v265_v22 = vld [vmem:[%s258_s15 + $0x30] sm:$0xff]  ;;  %v266_v29 = vld [vmem:[%s258_s15 + $0x38] sm:$0xff]  ;;  %s1080_s15 = sshll.u32 %s1150_s14, 4  ;;  %p846_p2 = por %p845_p1, %p844_p0  ;;  %s662_s15 = int_to_ptr.vmem [resolvable:$true] %s1080_s15 }
  0x1c   : > { %v292_v17 = vmul.f32 %v262_v5, %v262_v5  ;;  %v275_v18 = vsel %vm267_vm1, %v263_v10, 0.0  ;;  %v293_v19 = vmul.f32 %v263_v10, %v263_v10  ;;  %v297_v20 = vsel %vm267_vm1, %v289_v9, 0.0  ;;  %v623_v9 = vld [vmem:[%s1146_s3] sm:$0x1] }
  0x1d   : > { %v272_v16 = vadd.f32 %v271_v8, %v270_v11  ;;  %v298_v21 = vsel %vm267_vm1, %v290_v13, 0.0  ;;  %v300_v25 = vsel %vm267_vm1, %v291_v14, 0.0  ;;  %v277_v26 = vsel %vm267_vm1, %v264_v15, 0.0  ;;  %p847_p3 = pnand %p846_p2, %p840_p13 }
  0x1e   : > { %v299_v24 = vadd.f32 %v298_v21, %v297_v20  ;;  %v294_v27 = vmul.f32 %v264_v15, %v264_v15  ;;  %v302_v28 = vsel %vm267_vm1, %v292_v17, 0.0  ;;  %v279_v32 = vsel %vm267_vm1, %v265_v22, 0.0 }
  0x1f   : > { %v274_v23 = vadd.f32 %v273_v12, %v272_v16  ;;  %v295_v33 = vmul.f32 %v265_v22, %v265_v22  ;;  %v304_v34 = vsel %vm267_vm1, %v293_v19, 0.0  ;;  %v281_v37 = vsel %vm267_vm1, %v266_v29, 0.0  ;;  %v627_v12 = vld [vmem:[%s1147_s4] sm:$0x1] }
  0x20   : > { %v301_v31 = vadd.f32 %v300_v25, %v299_v24  ;;  %v296_v38 = vmul.f32 %v266_v29, %v266_v29  ;;  %v306_v39 = vsel %vm267_vm1, %v294_v27, 0.0 }
  0x21   : > { %v276_v30 = vadd.f32 %v275_v18, %v274_v23  ;;  %v308_v42 = vsel %vm267_vm1, %v295_v33, 0.0 }
  0x22   : > { %v303_v36 = vadd.f32 %v302_v28, %v301_v31  ;;  %v310_v45 = vsel %vm267_vm1, %v296_v38, 0.0 }
  0x23   : > { %v278_v35 = vadd.f32 %v277_v26, %v276_v30 }
  0x24   : > { %v305_v41 = vadd.f32 %v304_v34, %v303_v36 }
  0x25   : > { %v280_v40 = vadd.f32 %v279_v32, %v278_v35 }
  0x26   : > { %v307_v44 = vadd.f32 %v306_v39, %v305_v41 }
  0x27   : > { %v282_v43 = vadd.f32 %v281_v37, %v280_v40 }
  0x28   : > { %v309_v47 = vadd.f32 %v308_v42, %v307_v44 }
  0x29   : > { %v283_v46 = vrot.slane %v282_v43, 4 }
  0x2a   : > { %v311_v49 = vadd.f32 %v310_v45, %v309_v47 }
  0x2b   : > { %v284_v48 = vadd.f32 %v283_v46, %v282_v43 }
  0x2c   : > { %v312_v51 = vrot.slane %v311_v49, 4 }
  0x2d   : > { %v285_v50 = vrot.slane %v284_v48, 2 }
  0x2e   : > { %v313_v53 = vadd.f32 %v312_v51, %v311_v49 }
  0x2f   : > { %v286_v52 = vadd.f32 %v285_v50, %v284_v48 }
  0x30   : > { %v314_v55 = vrot.slane %v313_v53, 2 }
  0x31   : > { %v287_v54 = vrot.slane %v286_v52, 1 }
  0x32   : > { %v315_v57 = vadd.f32 %v314_v55, %v313_v53 }
  0x33   : > { %v288_v56 = vadd.f32 %v287_v54, %v286_v52 }
  0x34   : > { %v316_v58 = vrot.slane %v315_v57, 1 }
  0x35   : > { %772 = vmatmul.mubr.msk.f32.vlgmr.msra.gmra.mxu0 %vm267_vm1, %v288_v56 }
  0x36   : > { %781 = vmatprep.mubr.msk.f32.mxu0 %vm930_vm0, %v929_v1  ;;  %v317_v59 = vadd.f32 %v316_v58, %v315_v57  ;;  %780 = vmatpush3.msk.msra.mxu0 %vm476_vm2, %v471_v60 }
  0x38   : > { %777 = vmatmul.mubr.msk.f32.vlgmr.msra.gmra.mxu1 %vm267_vm1, %v317_v59 }
  0x39   : > { %786 = vmatprep.mubr.msk.f32.mxu1 %vm930_vm0, %v929_v1  ;;  %785 = vmatpush3.msk.msra.mxu1 %vm476_vm2, %v471_v60 }
  0xf5   : > { %v388_v61 = vpop.f32.mrf.mxu0 }
  0xf6   : > { %v392_v62 = vmul.f32 0.00390625, %v388_v61 }
  0xf7   : > { %v773_v63 = vpop.f32.mrf.mxu0 }
  0xf8   : > { %v467_v0 = vmul.f32 %v392_v62, %v392_v62  ;;  %782 = vmatmul.mubr.msk.f32.vlgmr.msra.gmra.mxu0 %vm472_vm3, %v392_v62  ;;  %v462_v2 = vpop.f32.mrf.mxu1 }
  0xf9   : > { %v466_v3 = vmul.f32 0.00390625, %v462_v2 }
  0xfa   : > { %v778_v4 = vpop.f32.mrf.mxu1 }
  0xfb   : > { %v468_v1 = vsub.f32 %v466_v3, %v467_v0 }
  0xfd   : > { %v469_v5 = vadd.f32 1e-05, %v468_v1 }
  0xff   : > { %835 = vrsqrt.f32 %v469_v5 }
 0x10c   : > { %v836_v6 = vpop.eup %835 }
 0x10d   : > { %787 = vmatmul.mubr.msk.f32.vlgmr.msra.gmra.mxu1 %vm472_vm3, %v836_v6 }
 0x1b8   : > { %v546_v7 = vpop.f32.mrf.mxu0 }
 0x1ba   : > { %v783_v8 = vpop.f32.mrf.mxu0 }
 0x1cd   : > { %v619_v10 = vpop.f32.mrf.mxu1 }
 0x1ce   : > { %v624_v11 = vmul.f32 %v623_v9, %v619_v10 }
 0x1cf   : > { %v788_v13 = vpop.f32.mrf.mxu1 }
 0x1d0   : > { %v628_v14 = vmul.f32 %v624_v11, %v546_v7  ;;  %626 = vst.msk [vmem:[%s247_s28] sm:$0x1] %vm625_vm4, %v624_v11 }
 0x1d1   : > { %850 = shalt.err (!%p847_p3)
}
 0x1d2   : > { %s851_s28 = scalar_lea.hbm %s1070_s11, 16  ;;  %s855_s13 = scalar_lea.hbm %s1148_s5, 32 }
 0x1d3   : > { %p852_p4 = scmp.ne.s32.totalorder %s1070_s11, %s851_s28  ;;  %p856_p9 = scmp.lt.s32.totalorder %s1070_s11, %s1148_s5 }
 0x1d4   : > { %p857_p10 = scmp.lt.s32.totalorder %s855_s13, %s851_s28 }
 0x1d5   : > { %p853_p7 = pnand %p852_p4, %p1006_p5 }
 0x1d6   : > { %p858_p11 = por %p857_p10, %p856_p9 }
 0x1d7   : > { %p854_p8 = pneg %p853_p7 }
 0x1d9   : > { %p859_p12 = pnand %p858_p11, %p854_p8 }
 0x1db   : > { %862 = shalt.err (!%p859_p12)
}
 0x1dc   : > { %789 = dma.vmem_to_hbm [thread:$0]  (%p1006_p5), %s1072_s29, 16, %s1070_s11, %s632_s16   ;;  %v629_v15 = vsub.f32 %v627_v12, %v628_v14 }
 0x1dd   : > { %s659_s14 = scalar_lea.hbm %s1149_s6, %s756_s26  ;;  %s1153_s9 = scalar_lea.vmem [#allocation4], %s1058_s18 }
 0x1de   : > { %630 = vst.msk [vmem:[%s1153_s9] sm:$0x1] %vm625_vm4, %v629_v15  ;;  %s636_s28 = scalar_lea.sflag [#allocation5], %s1058_s18  ;;  %s863_s10 = scalar_lea.vmem %s662_s15, 16 }
 0x1df   : > { %p864_p13 = scmp.ne.s32.totalorder %s662_s15, %s863_s10  ;;  %s932_s12 = smov [#allocation4]  }
 0x1e0   : > { %s867_s13 = sshll.u32 %s932_s12, 4  ;;  %s868_s13 = int_to_ptr.vmem [resolvable:$false] %s867_s13 }
 0x1e1   : > { %p865_p0 = pnand %p864_p13, %p1006_p5  ;;  %s869_s29 = scalar_lea.vmem %s868_s13, 32 }
 0x1e2   : > { %p870_p2 = scmp.lt.s32.totalorder %s662_s15, %s868_s13  ;;  %p871_p3 = scmp.lt.s32.totalorder %s869_s29, %s863_s10 }
 0x1e3   : > { %p866_p1 = pneg %p865_p0 }
 0x1e4   : > { %p872_p4 = por %p871_p3, %p870_p2 }
 0x1e6   : > { %p873_p7 = pnand %p872_p4, %p866_p1 }
 0x1e8   : > { %876 = shalt.err (!%p873_p7)
}
 0x1e9   : > { %s877_s25 = scalar_lea.hbm %s659_s14, 16  ;;  %s881_s11 = scalar_lea.hbm %s1149_s6, 32 }
 0x1ea   : > { %p878_p8 = scmp.ne.s32.totalorder %s659_s14, %s877_s25  ;;  %p882_p11 = scmp.lt.s32.totalorder %s659_s14, %s1149_s6 }
 0x1eb   : > { %p883_p12 = scmp.lt.s32.totalorder %s881_s11, %s877_s25 }
 0x1ec   : > { %p879_p9 = pnand %p878_p8, %p1006_p5 }
 0x1ed   : > { %p884_p13 = por %p883_p12, %p882_p11 }
 0x1ee   : > { %p880_p10 = pneg %p879_p9 }
 0x1f0   : > { %p885_p0 = pnand %p884_p13, %p880_p10 }
 0x1f2   : > { %888 = shalt.err (!%p885_p0)
}
 0x1f3   : > { %790 = dma.vmem_to_hbm [thread:$0]  (%p1006_p5), %s662_s15, 16, %s659_s14, %s636_s28  }
 0x1f4 PF: > { %p800_p1 = scmp.ge.s32.totalorder %s927_s24, 2  ;;  %s673_s17 = sand.u32 1, %s915_s21  }
 0x1f5   : > { %s674_s20 = scalar_lea.sflag [#allocation3], %s673_s17 }
 0x1f6   : > { %p794_p2 = pnand %p800_p1, %p1010_p6 }
 0x1f8   : > { %p795_p3 = pneg %p794_p2 }
 0x1fa   : > { %906 = dma.done.wait (%p795_p3), %s674_s20, 16  }
 0x1fb   : > { %908 = vsyncadd (%p795_p3), %s674_s20, 4294967280  ;;  %s682_s9 = scalar_lea.sflag [#allocation5], %s673_s17 }
 0x1fc   : > { %910 = dma.done.wait (%p795_p3), %s682_s9, 16  }
 0x1fd   : > { %912 = vsyncadd (%p795_p3), %s682_s9, 4294967280  ;;  %p20_p5 = scmp.ge.s32.totalorder %s993_s27, 4   ;;  %s1154_s21 = smov %s919_s22 }
 0x1fe   : > { %s1155_s22 = smov %s923_s23  ;;  %s1156_s23 = smov %s1004_s30 }
 0x1ff   : > { %s1157_s24 = smov %s993_s27  ;;  %22 = sbr.rel (!%p20_p5) target bundleno = 5 (0x5), region = 92 }
 0x204   :  { %686 = vsyncpa [#allocation3], 1 }
 0x205   :  { %688 = vsyncpa [#allocation3 + $0x1], 1 }
 0x206   :  { %689 = vsyncpa [#allocation5], 1 }
 0x207   :  { %691 = vsyncpa [#allocation5 + $0x1], 1 }

</bundles_post_ra>
